<compile_context>
chip_gen: v6e
topology: v6e:2x2x1
jax: 0.10.0
libtpu: 0.0.40
codegen_flags: <defaults>
</compile_context>

<pallas_src>
import functools

import jax
import jax.numpy as jnp
from jax.experimental import pallas as pl
from jax.experimental.pallas import tpu as pltpu


LANE = 128      # TPU lane width
SUBLANE = 8     # TPU sublane width (f32)


def _round_up(n: int, m: int) -> int:
    return (n + m - 1) // m * m


def fcq_kernel(x_ref, w1_ref, b1_ref, w2_ref, b2_ref, o_ref):
    # x:  [TB, D_in]      f32  (cast to bf16 here; saves a wrapper HBM pass)
    # w1: [D_in, H_p]     bf16      b1: [1, H_p]      f32
    # w2: [H_p, D_out_p]  bf16      b2: [1, D_out_p]  f32
    # o:  [TB, D_out_p]   f32 or bf16
    x = x_ref[...].astype(jnp.bfloat16)
    h = jnp.dot(x, w1_ref[...], preferred_element_type=jnp.float32) + b1_ref[...]
    h = jnp.maximum(h, 0.0).astype(jnp.bfloat16)          # fused bias + ReLU
    q = jnp.dot(h, w2_ref[...], preferred_element_type=jnp.float32) + b2_ref[...]
    o_ref[...] = q.astype(o_ref.dtype)


def prepare_fcq_params(w1, b1, w2, b2):
    """One-time conversion of [in, out] f32 params into kernel layout.

    Weights -> bf16, output dims zero-padded to 128 lanes (lane-dense stores /
    full MXU passes).  Biases -> padded f32.  Call once, reuse every forward.
    """
    d_in, h = w1.shape
    d_out = w2.shape[1]
    h_p = _round_up(h, LANE)
    d_out_p = _round_up(d_out, LANE)

    w1_p = jnp.zeros((d_in, h_p), jnp.bfloat16).at[:, :h].set(
        w1.astype(jnp.bfloat16))
    b1_p = jnp.zeros((1, h_p), jnp.float32).at[:, :h].set(
        b1.reshape(1, h).astype(jnp.float32))
    w2_p = jnp.zeros((h_p, d_out_p), jnp.bfloat16).at[:h, :d_out].set(
        w2.astype(jnp.bfloat16))
    b2_p = jnp.zeros((1, d_out_p), jnp.float32).at[:, :d_out].set(
        b2.reshape(1, d_out).astype(jnp.float32))
    return w1_p, b1_p, w2_p, b2_p


@functools.partial(
    jax.jit, static_argnames=("d_out", "block_b", "out_dtype", "trim_output"))
def fcq_forward(x, w1_p, b1_p, w2_p, b2_p, *, d_out,
                block_b: int = 1024, out_dtype=jnp.float32,
                trim_output: bool = True):
    """x: [B, D_in] f32 -> q: [B, d_out] (out_dtype).

    Params must already be in kernel layout (see prepare_fcq_params).
    """
    B, d_in = x.shape
    h_p = w1_p.shape[1]
    d_out_p = w2_p.shape[1]
    out_itemsize = jnp.dtype(out_dtype).itemsize

    # Batch tile: big for throughput, but capped so the grid has >=2 steps
    # (v7x megacore split) and at least one (8,)-aligned sublane tile.
    tb = min(block_b, max(SUBLANE, _round_up(pl.cdiv(B, 2), SUBLANE)))
    # Pad batch only to a sublane multiple (worst-case waste: 7 rows).
    b_p = _round_up(B, SUBLANE)
    if b_p != B:
        x = jnp.pad(x, ((0, b_p - B), (0, 0)))
    grid = (pl.cdiv(b_p, tb),)           # partial last tile is fine

    # Only bump the scoped-VMEM limit if a huge batch tile would need it
    # (relevant on v5e with f32 output and tb pushed past ~4K rows).
    vmem_need = (2 * tb * (d_in * x.dtype.itemsize + d_out_p * out_itemsize)
                 + w1_p.size * 2 + w2_p.size * 2
                 + (b1_p.size + b2_p.size) * 4)
    cp_kwargs = dict(dimension_semantics=("parallel",))
    if vmem_need > 12 * 1024 * 1024:
        cp_kwargs["vmem_limit_bytes"] = int(vmem_need * 1.5)

    flops = 2 * b_p * (d_in * h_p + h_p * d_out_p)
    bytes_accessed = (b_p * d_in * x.dtype.itemsize
                      + w1_p.size * 2 + w2_p.size * 2
                      + (b1_p.size + b2_p.size) * 4
                      + b_p * d_out_p * out_itemsize)

    out = pl.pallas_call(
        fcq_kernel,
        out_shape=jax.ShapeDtypeStruct((b_p, d_out_p), out_dtype),
        grid_spec=pltpu.PrefetchScalarGridSpec(
            num_scalar_prefetch=0,
            grid=grid,
            in_specs=[
                # Activations: tiled over batch; last dim = full 81 (legal).
                pl.BlockSpec((tb, d_in), lambda i: (i, 0)),
                # Weights / biases: constant index_map -> VMEM-resident.
                pl.BlockSpec((d_in, h_p), lambda i: (0, 0)),
                pl.BlockSpec((1, h_p), lambda i: (0, 0)),
                pl.BlockSpec((h_p, d_out_p), lambda i: (0, 0)),
                pl.BlockSpec((1, d_out_p), lambda i: (0, 0)),
            ],
            out_specs=pl.BlockSpec((tb, d_out_p), lambda i: (i, 0)),
        ),
        compiler_params=pltpu.CompilerParams(**cp_kwargs),
        cost_estimate=pl.CostEstimate(
            flops=flops, transcendentals=0, bytes_accessed=bytes_accessed),
    )(x, w1_p, b1_p, w2_p, b2_p)

    if trim_output:
        # Consumers that can mask lanes >= d_out (e.g. argmax over legal moves)
        # should pass trim_output=False to skip this extra HBM pass.
        return out[:B, :d_out]
    return out   # padded: [round_up(B,8), 128]


def fcq_forward_auto(x, params, *, d_out, small_batch_threshold=64, **kw):
    """Dispatch helper: below the threshold the pallas_call launch dominates,
    so use a plain fused jnp path with the same bf16-operand numerics."""
    if x.shape[0] <= small_batch_threshold:
        w1_p, b1_p, w2_p, b2_p = params
        h = jnp.maximum(
            jnp.dot(x.astype(jnp.bfloat16), w1_p,
                    preferred_element_type=jnp.float32) + b1_p, 0.0)
        q = jnp.dot(h.astype(jnp.bfloat16), w2_p,
                    preferred_element_type=jnp.float32) + b2_p
        return q[:, :d_out]
    return fcq_forward(x, *params, d_out=d_out, **kw)


def init_fcq_params(key, board_size=9, hidden_size=128):
    """torch.nn.Linear-style init (U[-1/sqrt(fan_in), +1/sqrt(fan_in)]).
    Weights returned as [in, out] so the kernel computes x @ W directly."""
    d = board_size * board_size
    k1, k2, k3, k4 = jax.random.split(key, 4)
    bound1 = 1.0 / jnp.sqrt(d)
    bound2 = 1.0 / jnp.sqrt(hidden_size)
    w1 = jax.random.uniform(k1, (d, hidden_size), jnp.float32, -bound1, bound1)
    b1 = jax.random.uniform(k2, (1, hidden_size), jnp.float32, -bound1, bound1)
    w2 = jax.random.uniform(k3, (hidden_size, d), jnp.float32, -bound2, bound2)
    b2 = jax.random.uniform(k4, (1, d), jnp.float32, -bound2, bound2)
    return w1, b1, w2, b2


def reference_forward_f32(x, w1, b1, w2, b2):
    h = jnp.maximum(x @ w1 + b1, 0.0)
    return h @ w2 + b2


def reference_forward_bf16(x, w1, b1, w2, b2):
    """Mirrors the kernel's bf16-operand / f32-accumulation numerics."""
    xb = x.astype(jnp.bfloat16).astype(jnp.float32)
    w1b = w1.astype(jnp.bfloat16).astype(jnp.float32)
    w2b = w2.astype(jnp.bfloat16).astype(jnp.float32)
    h = jnp.maximum(xb @ w1b + b1, 0.0)
    h = h.astype(jnp.bfloat16).astype(jnp.float32)
    return h @ w2b + b2


if __name__ == "__main__":
    board_size = 9
    hidden_size = 128
    d = board_size * board_size

    key = jax.random.PRNGKey(0)
    k_params, k_x1, k_x2 = jax.random.split(key, 3)

    w1, b1, w2, b2 = init_fcq_params(k_params, board_size, hidden_size)
    params = prepare_fcq_params(w1, b1, w2, b2)   # one-time, kernel layout

    # Tiny demo batch (production: batch MCTS leaf evaluations, e.g. >= 256).
    x = jax.random.randint(k_x1, (2, d), -1, 2).astype(jnp.float32)
    q = jax.block_until_ready(fcq_forward(x, *params, d_out=d))
    assert q.shape == (2, d) and q.dtype == jnp.float32

    q_ref_bf16 = reference_forward_bf16(x, w1, b1, w2, b2)
    assert jnp.allclose(q, q_ref_bf16, atol=1e-3, rtol=1e-3)
    q_ref_f32 = reference_forward_f32(x, w1, b1, w2, b2)
    assert jnp.allclose(q, q_ref_f32, atol=5e-2, rtol=5e-2)

    # Non-multiple-of-8 batch exercises the cdiv grid / partial last tile,
    # plus the bf16-output option.
    x2 = jax.random.randint(k_x2, (37, d), -1, 2).astype(jnp.float32)
    q2 = jax.block_until_ready(
        fcq_forward(x2, *params, d_out=d, out_dtype=jnp.bfloat16))
    assert q2.shape == (37, d) and q2.dtype == jnp.bfloat16
    q2_ref = reference_forward_bf16(x2, w1, b1, w2, b2)
    assert jnp.allclose(q2.astype(jnp.float32), q2_ref, atol=5e-2, rtol=2e-2)

    print("KERNEL_OK")
</pallas_src>

<mosaic_0001>
module attributes {stable_mosaic.version = 11 : i64} {
  func.func @fcq_kernel(%arg0: i32, %arg1: memref<8x81xf32, #tpu.memory_space<vmem>>, %arg2: memref<81x128xbf16, #tpu.memory_space<vmem>>, %arg3: memref<1x128xf32, #tpu.memory_space<vmem>>, %arg4: memref<128x128xbf16, #tpu.memory_space<vmem>>, %arg5: memref<1x128xf32, #tpu.memory_space<vmem>>, %arg6: memref<8x128xf32, #tpu.memory_space<vmem>>) attributes {dimension_semantics = [#tpu.dimension_semantics<parallel>], iteration_bounds = array<i64: 1>, scalar_prefetch = 0 : i64, scratch_operands = 0 : i64, tpu.core_type = #tpu.core_type<tc>, window_params = [{transform_indices = @transform_0, window_bounds = array<i64: 8, 81>}, {pipeline_mode = #tpu.pipeline_mode<synchronous>, transform_indices = @transform_1, window_bounds = array<i64: 81, 128>}, {pipeline_mode = #tpu.pipeline_mode<synchronous>, transform_indices = @transform_2, window_bounds = array<i64: 1, 128>}, {pipeline_mode = #tpu.pipeline_mode<synchronous>, transform_indices = @transform_3, window_bounds = array<i64: 128, 128>}, {pipeline_mode = #tpu.pipeline_mode<synchronous>, transform_indices = @transform_4, window_bounds = array<i64: 1, 128>}, {transform_indices = @transform_5, window_bounds = array<i64: 8, 128>}]} {
    %c0 = arith.constant 0 : index
    %c0_0 = arith.constant 0 : index
    %0 = vector.load %arg1[%c0, %c0_0] : memref<8x81xf32, #tpu.memory_space<vmem>>, vector<8x81xf32>
    %1 = arith.truncf %0 : vector<8x81xf32> to vector<8x81xbf16>
    %c0_1 = arith.constant 0 : index
    %c0_2 = arith.constant 0 : index
    %2 = vector.load %arg2[%c0_1, %c0_2] : memref<81x128xbf16, #tpu.memory_space<vmem>>, vector<81x128xbf16>
    %cst = arith.constant dense<0.000000e+00> : vector<8x128xf32>
    %3 = tpu.matmul %1, %2, %cst {dimension_numbers = #tpu.dot_dimension_numbers<[1], [0], [0], [1], [0, 0, 1, 1], [], []>} : vector<8x81xbf16>, vector<81x128xbf16>, vector<8x128xf32> -> vector<8x128xf32>
    %c0_3 = arith.constant 0 : index
    %c0_4 = arith.constant 0 : index
    %4 = vector.load %arg3[%c0_3, %c0_4] : memref<1x128xf32, #tpu.memory_space<vmem>>, vector<1x128xf32>
    %5 = vector.broadcast %4 : vector<1x128xf32> to vector<8x128xf32>
    %6 = arith.addf %3, %5 : vector<8x128xf32>
    %cst_5 = arith.constant 0.000000e+00 : f32
    %7 = vector.broadcast %cst_5 : f32 to vector<8x128xf32>
    %8 = arith.maximumf %6, %7 : vector<8x128xf32>
    %9 = arith.truncf %8 : vector<8x128xf32> to vector<8x128xbf16>
    %c0_6 = arith.constant 0 : index
    %c0_7 = arith.constant 0 : index
    %10 = vector.load %arg4[%c0_6, %c0_7] : memref<128x128xbf16, #tpu.memory_space<vmem>>, vector<128x128xbf16>
    %cst_8 = arith.constant dense<0.000000e+00> : vector<8x128xf32>
    %11 = tpu.matmul %9, %10, %cst_8 {dimension_numbers = #tpu.dot_dimension_numbers<[1], [0], [0], [1], [0, 0, 1, 1], [], []>} : vector<8x128xbf16>, vector<128x128xbf16>, vector<8x128xf32> -> vector<8x128xf32>
    %c0_9 = arith.constant 0 : index
    %c0_10 = arith.constant 0 : index
    %12 = vector.load %arg5[%c0_9, %c0_10] : memref<1x128xf32, #tpu.memory_space<vmem>>, vector<1x128xf32>
    %13 = vector.broadcast %12 : vector<1x128xf32> to vector<8x128xf32>
    %14 = arith.addf %11, %13 : vector<8x128xf32>
    %c0_11 = arith.constant 0 : index
    %c0_12 = arith.constant 0 : index
    %15 = vector.load %arg6[%c0_11, %c0_12] : memref<8x128xf32, #tpu.memory_space<vmem>>, vector<8x128xf32>
    tpu.vector_store %arg6[%c0_11, %c0_12], %14 {strides = array<i32>} : memref<8x128xf32, #tpu.memory_space<vmem>>, vector<8x128xf32>,
    return
  }
  func.func @transform_0(%arg0: i32) -> (i32, i32) {
    %c0_i32 = arith.constant 0 : i32
    %c0_i32_0 = arith.constant 0 : i32
    return %arg0, %c0_i32 : i32, i32
  }
  func.func @transform_1(%arg0: i32) -> (i32, i32) {
    %c0_i32 = arith.constant 0 : i32
    %c0_i32_0 = arith.constant 0 : i32
    %c0_i32_1 = arith.constant 0 : i32
    return %c0_i32, %c0_i32_0 : i32, i32
  }
  func.func @transform_2(%arg0: i32) -> (i32, i32) {
    %c0_i32 = arith.constant 0 : i32
    %c0_i32_0 = arith.constant 0 : i32
    %c0_i32_1 = arith.constant 0 : i32
    return %c0_i32, %c0_i32_0 : i32, i32
  }
  func.func @transform_3(%arg0: i32) -> (i32, i32) {
    %c0_i32 = arith.constant 0 : i32
    %c0_i32_0 = arith.constant 0 : i32
    %c0_i32_1 = arith.constant 0 : i32
    return %c0_i32, %c0_i32_0 : i32, i32
  }
  func.func @transform_4(%arg0: i32) -> (i32, i32) {
    %c0_i32 = arith.constant 0 : i32
    %c0_i32_0 = arith.constant 0 : i32
    %c0_i32_1 = arith.constant 0 : i32
    return %c0_i32, %c0_i32_0 : i32, i32
  }
  func.func @transform_5(%arg0: i32) -> (i32, i32) {
    %c0_i32 = arith.constant 0 : i32
    %c0_i32_0 = arith.constant 0 : i32
    return %arg0, %c0_i32 : i32, i32
  }
}

</mosaic_0001>

<bundles_post_ra>
// kernel: fcq_forward.1
= control target key start
LH: loop header
LB: loop body
LE: loop exit
PB: predicated region body
PF: predicated region fallthrough
CT: control target
= control target key end

     0   :  { %10 = vsyncpa [#allocation3], 0  ;;  %s461_s0 = inlined_call_operand.vmem [shape: f32[8,81], index: 0, kind: input, shape index: {}]   ;;  %s462_s1 = inlined_call_operand.hbm [shape: bf16[81,128], index: 1, kind: input, shape index: {}]   ;;  %s463_s2 = inlined_call_operand.vmem [shape: f32[1,128], index: 2, kind: input, shape index: {}]   ;;  %s464_s3 = inlined_call_operand.hbm [shape: bf16[128,128], index: 3, kind: input, shape index: {}]   ;;  %s465_s4 = inlined_call_operand.vmem [shape: f32[1,128], index: 4, kind: input, shape index: {}]   ;;  %s466_s5 = inlined_call_operand.vmem [shape: f32[8,128], index: 5, kind: output, shape index: {}]  }
   0x1   :  { %11 = vsyncpa [#allocation5], 0  ;;  %s406_s18 = smov [#allocation2]  }
   0x2   :  { %s19_s19 = sshll.u32 %s406_s18, 4  ;;  %s20_s19 = int_to_ptr.vmem [resolvable:$true] %s19_s19 }
   0x3   :  { %s370_s20 = scalar_lea.vmem %s20_s19, 704  ;;  %p375_p1 = scmp.lt.s32.totalorder %s20_s19, %s20_s19 }
   0x4   :  { %p371_p0 = scmp.ne.s32.totalorder %s20_s19, %s370_s20  ;;  %p376_p2 = scmp.lt.s32.totalorder %s370_s20, %s370_s20 }
   0x6   :  { %p377_p3 = por %p376_p2, %p375_p1 }
   0x8   :  { %p378_p4 = pnand %p377_p3, %p371_p0 }
   0xa   :  { %381 = shalt.err (!%p378_p4)
}
   0xb   :  { %s407_s21 = smov 64   ;;  %s408_s22 = smov 4  }
   0xc   :  { %25 = dma.hbm_to_vmem [thread:$0]  %s462_s1, 704, %s20_s19, [#allocation3], %s407_s21, %s407_s21, %s408_s22  }
   0xd   :  { %s409_s25 = smov [#allocation4]  }
   0xe   :  { %s33_s26 = sshll.u32 %s409_s25, 4  ;;  %s34_s26 = int_to_ptr.vmem [resolvable:$true] %s33_s26 }
   0xf   :  { %s390_s27 = scalar_lea.vmem %s34_s26, 1024  ;;  %p395_p6 = scmp.lt.s32.totalorder %s34_s26, %s34_s26 }
  0x10   :  { %p391_p5 = scmp.ne.s32.totalorder %s34_s26, %s390_s27  ;;  %p396_p7 = scmp.lt.s32.totalorder %s390_s27, %s390_s27 }
  0x12   :  { %p397_p8 = por %p396_p7, %p395_p6 }
  0x14   :  { %p398_p9 = pnand %p397_p8, %p391_p5 }
  0x16   :  { %401 = shalt.err (!%p398_p9)
}
  0x17   :  { %39 = dma.hbm_to_vmem [thread:$0]  %s464_s3, 1024, %s34_s26, [#allocation5], %s407_s21, %s407_s21, %s408_s22  }
  0x18   :  { %402 = dma.done.wait [#allocation3], 704  }
  0x19   :  { %403 = vsyncadd [#allocation3], 4294966592 }
  0x1a   :  { %404 = dma.done.wait [#allocation5], 1024  }
  0x1b   :  { %405 = vsyncadd [#allocation5], 4294966272  ;;  %v410_v0 = vmov 0.0   ;;  %vm411_vm0 = vmmov 0   ;;  %vm106_vm1 = vcmask 1040384   ;;  %v412_v1 = vmov 0  }
  0x1c   :  { %305 = vmatprep.subr.bf16.mxu0 %v410_v0  ;;  %317 = vmatprep.mubr.msk.bf16.mxu0 %vm411_vm0, %v410_v0  ;;  %v108_v2 = vsel %vm106_vm1, 65535, %v412_v1  ;;  %v348_v3 = vld [vmem:[#allocation2 + $0x28] ss:$0 sps:$4 sm:$0x11]   ;;  %v349_v5 = vld [vmem:[#allocation2 + $0x20] sm:$0xff]   ;;  %v350_v7 = vld [vmem:[#allocation2 + $0x18] sm:$0xff]  }
  0x1d   :  { %321 = vmatprep.subr.bf16.mxu1 %v410_v0  ;;  %337 = vmatprep.mubr.msk.bf16.mxu1 %vm411_vm0, %v410_v0  ;;  %v110_v4 = vand.u32 %v348_v3, %v108_v2  ;;  %v354_v6 = vld [vmem:[#allocation4 + $0x38] sm:$0xff]   ;;  %v355_v8 = vld [vmem:[#allocation4 + $0x30] sm:$0xff]   ;;  %v351_v9 = vld [vmem:[#allocation2 + $0x10] sm:$0xff]   ;;  %vm102_vm2 = vcmask 662528  }
  0x1e   :  { %322 = vmatpush3.bf16.msra.mxu1 %v354_v6  ;;  %v356_v10 = vld [vmem:[#allocation4 + $0x28] sm:$0xff]   ;;  %v352_v11 = vld [vmem:[#allocation2 + $0x8] sm:$0xff]   ;;  %v353_v13 = vld [vmem:[#allocation2] sm:$0xff]  }
  0x1f   :  { %306 = vmatpush3.bf16.msra.mxu0 %v110_v4  ;;  %323 = vmatprep.subr.bf16.mxu1 %v410_v0  ;;  %v357_v12 = vld [vmem:[#allocation4 + $0x20] sm:$0xff]   ;;  %v49_v14 = vld [vmem:[%s461_s0] sm:$0xff]  ;;  %v360_v18 = vld [vmem:[#allocation4 + $0x8] sm:$0xff]  }
  0x20   :  { %307 = vmatprep.subr.bf16.mxu0 %v410_v0  ;;  %v358_v15 = vld [vmem:[#allocation4 + $0x18] sm:$0xff]   ;;  %v50_v16 = vpack.c.bf16 %v49_v14, %v49_v14  ;;  %v359_v17 = vld [vmem:[#allocation4 + $0x10] sm:$0xff]   ;;  %v361_v19 = vld [vmem:[#allocation4] sm:$0xff]  }
  0x21   :  { %v272_v20 = vld [vmem:[%s463_s2] ss:$0 sm:$0xff] }
  0x22   :  { %324 = vmatpush3.bf16.msra.mxu1 %v355_v8  ;;  %v280_v28 = vld [vmem:[%s465_s4] ss:$0 sm:$0xff] }
  0x23   :  { %308 = vmatpush3.bf16.msra.mxu0 %v349_v5  ;;  %325 = vmatprep.subr.bf16.mxu1 %v410_v0 }
  0x24   :  { %309 = vmatprep.subr.bf16.mxu0 %v410_v0 }
  0x26   :  { %326 = vmatpush3.bf16.msra.mxu1 %v356_v10 }
  0x27   :  { %310 = vmatpush3.bf16.msra.mxu0 %v350_v7  ;;  %327 = vmatprep.subr.bf16.mxu1 %v410_v0 }
  0x28   :  { %311 = vmatprep.subr.bf16.mxu0 %v410_v0 }
  0x2a   :  { %328 = vmatpush3.bf16.msra.mxu1 %v357_v12 }
  0x2b   :  { %312 = vmatpush3.bf16.msra.mxu0 %v351_v9  ;;  %329 = vmatprep.subr.bf16.mxu1 %v410_v0 }
  0x2c   :  { %313 = vmatprep.subr.bf16.mxu0 %v410_v0 }
  0x2e   :  { %330 = vmatpush3.bf16.msra.mxu1 %v358_v15 }
  0x2f   :  { %314 = vmatpush3.bf16.msra.mxu0 %v352_v11  ;;  %331 = vmatprep.subr.bf16.mxu1 %v410_v0 }
  0x30   :  { %315 = vmatprep.subr.bf16.mxu0 %v410_v0 }
  0x32   :  { %332 = vmatpush3.bf16.msra.mxu1 %v359_v17 }
  0x33   :  { %316 = vmatpush3.bf16.msra.mxu0 %v353_v13  ;;  %333 = vmatprep.subr.bf16.mxu1 %v410_v0 }
  0x36   :  { %318 = vmatmul.mubr.msk.bf16.vlgmr.msra.gmra.mxu0 %vm102_vm2, %v50_v16  ;;  %334 = vmatpush3.bf16.msra.mxu1 %v360_v18 }
  0x37   :  { %335 = vmatprep.subr.bf16.mxu1 %v410_v0 }
  0x3a   :  { %336 = vmatpush3.bf16.msra.mxu1 %v361_v19 }
  0xf6   :  { %v146_v21 = vpop.f32.mrf.mxu0 }
  0xf7   :  { %v147_v22 = vadd.f32 %v272_v20, %v146_v21 }
  0xf8   :  { %v319_v23 = vpop.f32.mrf.mxu0 }
  0xf9   :  { %v152_v24 = vmax.f32 %v147_v22, 0.0 }
  0xfa   :  { %v149_v25 = vpop.f32.mrf.mxu0 }
  0xfb   :  { %v153_v26 = vpack.c.bf16 %v152_v24, %v152_v24 }
  0xfc   :  { %v320_v27 = vpop.f32.mrf.mxu0 }
  0xfd   :  { %338 = vmatmul.mubr.bf16.vlgmr.msra.gmra.mxu1 %v153_v26 }
 0x1bd   :  { %v259_v29 = vpop.f32.mrf.mxu1 }
 0x1be   :  { %v260_v30 = vadd.f32 %v280_v28, %v259_v29 }
 0x1bf   :  { %v339_v31 = vpop.f32.mrf.mxu1 }
 0x1c0   :  { %265 = vst [vmem:[%s466_s5] sm:$0xff] %v260_v30 }
 0x1c1   :  { %v262_v32 = vpop.f32.mrf.mxu1 }
 0x1c3   :  { %v340_v33 = vpop.f32.mrf.mxu1 }
 0x1c4   :  { %270 = vsyncpa [#allocation3], 1 }
 0x1c5   :  { %271 = vsyncpa [#allocation5], 1 }

</bundles_post_ra>
